<compile_context>
chip_gen: v7x
topology: tpu7x:2x2x1
jax: 0.10.0
libtpu: 0.0.40
codegen_flags: <defaults>
</compile_context>

<pallas_src>
import functools

import jax
import jax.numpy as jnp
from jax import lax
from jax.experimental import pallas as pl
from jax.experimental.pallas import tpu as pltpu


def _gpt_neo_attn_kernel(x_ref, wqkv_ref, wo_ref, bo_ref, out_ref,
                         acc_ref, k_ref, v_ref, m_ref, l_ref, ctx_ref,
                         *, seq, num_heads, head_dim, kv_chunk, matmul_dtype):
    h = pl.program_id(1)
    D = head_dim
    num_chunks = seq // kv_chunk
    neg_big = jnp.finfo(jnp.float32).min

    # Zero the cross-head output accumulator at the first head of this batch.
    @pl.when(h == 0)
    def _():
        acc_ref[...] = jnp.zeros_like(acc_ref)

    def mm(a, b):
        # MXU matmul: operands optionally downcast (bf16 on v6e/v7x), f32 acc.
        return jnp.dot(a.astype(matmul_dtype), b.astype(matmul_dtype),
                       preferred_element_type=jnp.float32)

    x = x_ref[0]                               # (S, E), resident across heads
    w_qkv = wqkv_ref[0]                        # (E, 3*D) fused head weights

    # One fused projection matmul -> q | k | v for this (batch, head).
    qkv = mm(x, w_qkv)                         # (S, 3*D) f32
    q = qkv[:, 0:D]
    k_ref[...] = qkv[:, D:2 * D]
    v_ref[...] = qkv[:, 2 * D:3 * D]

    # Online-softmax state (flash-style over kv chunks).
    m_ref[...] = jnp.full_like(m_ref, neg_big)
    l_ref[...] = jnp.zeros_like(l_ref)
    ctx_ref[...] = jnp.zeros_like(ctx_ref)

    q_mm = q.astype(matmul_dtype)
    row = lax.broadcasted_iota(jnp.int32, (seq, kv_chunk), 0)
    col = lax.broadcasted_iota(jnp.int32, (seq, kv_chunk), 1)

    @pl.loop(0, num_chunks)
    def _(c):
        start = pl.multiple_of(c * kv_chunk, kv_chunk)
        k_c = k_ref[pl.ds(start, kv_chunk), :]
        v_c = v_ref[pl.ds(start, kv_chunk), :]

        # Scores for this kv chunk; contraction over head_dim (no explicit k
        # transpose).  GPT-Neo applies NO 1/sqrt(head_dim) scaling.
        s = lax.dot_general(q_mm, k_c.astype(matmul_dtype),
                            dimension_numbers=(((1,), (1,)), ((), ())),
                            preferred_element_type=jnp.float32)  # (S, kv_chunk)

        # Causal mask from tile-offset iotas (no full (S, S) mask object).
        s = jnp.where((col + start) <= row, s, neg_big)

        m_prev = m_ref[...]
        m_new = jnp.maximum(m_prev, jnp.max(s, axis=-1, keepdims=True))
        alpha = jnp.exp(m_prev - m_new)
        p = jnp.exp(s - m_new)                                   # f32 softmax
        l_ref[...] = alpha * l_ref[...] + jnp.sum(p, axis=-1, keepdims=True)
        ctx_ref[...] = alpha * ctx_ref[...] + jnp.dot(
            p.astype(matmul_dtype), v_c.astype(matmul_dtype),
            preferred_element_type=jnp.float32)
        m_ref[...] = m_new

    # Normalize (EUP approx reciprocal; l >= 1 from the causal diagonal) and
    # fold this head straight into the output projection:
    #   out += ctx_h @ Wo[h*D:(h+1)*D, :]
    ctx = ctx_ref[...] * pl.reciprocal(l_ref[...], approx=True)
    acc_ref[...] += mm(ctx, wo_ref[0])

    @pl.when(h == num_heads - 1)
    def _():
        out_ref[0] = (acc_ref[...] + bo_ref[...]).astype(out_ref.dtype)


def _pick_kv_chunk(seq, cap=512):
    if seq <= cap:
        return seq
    for c in range(cap, 7, -1):
        if seq % c == 0 and c % 8 == 0:
            return c
    return seq


def _vmem_limit_bytes(seq, embed, head_dim, kv_chunk):
    f32 = 4
    # Per-step pipeline blocks (x, fused qkv weights, wo block, bias, out).
    blocks = (seq * embed) + (embed * 3 * head_dim) + (head_dim * embed) \
        + embed + (seq * embed)
    scratch = (seq * embed) + 3 * (seq * head_dim) + 2 * seq
    work = 4 * seq * kv_chunk + 2 * seq * 3 * head_dim
    total = (2 * blocks + scratch + work) * f32     # x2: double buffering
    total = int(total * 2)                          # compiler-temp headroom
    return max(8 * 1024 * 1024, min(total, 64 * 1024 * 1024))


def gpt_neo_self_attention(x, wq_t, wk_t, wv_t, wo_t, bo, *, num_heads,
                           matmul_dtype=jnp.float32):
    """x: (B, S, E) f32; w*_t: (E, E) pre-transposed weights; bo: (E,)."""
    B, S, E = x.shape
    assert E % num_heads == 0, "embed_dim must be divisible by num_heads"
    D = E // num_heads
    kv_chunk = _pick_kv_chunk(S)
    assert S % kv_chunk == 0

    # Per-head fused q|k|v column blocks: (H, E, 3*D).
    def per_head_cols(w_t):
        return w_t.reshape(E, num_heads, D).transpose(1, 0, 2)  # (H, E, D)

    w_qkv = jnp.concatenate(
        [per_head_cols(wq_t), per_head_cols(wk_t), per_head_cols(wv_t)],
        axis=-1)                                                  # (H, E, 3D)
    # Per-head out-projection row blocks: (H, D, E).
    w_o = wo_t.reshape(num_heads, D, E)
    bo2d = bo.reshape(1, E)

    kernel = functools.partial(
        _gpt_neo_attn_kernel, seq=S, num_heads=num_heads, head_dim=D,
        kv_chunk=kv_chunk, matmul_dtype=matmul_dtype)

    out = pl.pallas_call(
        kernel,
        out_shape=jax.ShapeDtypeStruct((B, S, E), x.dtype),
        grid_spec=pltpu.PrefetchScalarGridSpec(
            num_scalar_prefetch=0,
            grid=(B, num_heads),
            in_specs=[
                pl.BlockSpec((1, S, E), lambda b, h: (b, 0, 0)),      # x (resident over h)
                pl.BlockSpec((1, E, 3 * D), lambda b, h: (h, 0, 0)),  # fused Wq|Wk|Wv head block
                pl.BlockSpec((1, D, E), lambda b, h: (h, 0, 0)),      # Wo head row block
                pl.BlockSpec((1, E), lambda b, h: (0, 0)),            # out_proj bias
            ],
            out_specs=pl.BlockSpec((1, S, E), lambda b, h: (b, 0, 0)),
            scratch_shapes=[
                pltpu.VMEM((S, E), jnp.float32),   # cross-head output accumulator
                pltpu.VMEM((S, D), jnp.float32),   # k for this head
                pltpu.VMEM((S, D), jnp.float32),   # v for this head
                pltpu.VMEM((S, 1), jnp.float32),   # online-softmax row max
                pltpu.VMEM((S, 1), jnp.float32),   # online-softmax row sum
                pltpu.VMEM((S, D), jnp.float32),   # unnormalized context acc
            ]),
        compiler_params=pltpu.CompilerParams(
            dimension_semantics=("parallel", "arbitrary"),
            vmem_limit_bytes=_vmem_limit_bytes(S, E, D, kv_chunk)),
    )(x, w_qkv, w_o, bo2d)
    return out


def reference_gpt_neo_self_attention(x, wq_t, wk_t, wv_t, wo_t, bo, *, num_heads):
    """Plain-JAX reference matching the PyTorch module semantics."""
    B, S, E = x.shape
    D = E // num_heads
    q = x @ wq_t
    k = x @ wk_t
    v = x @ wv_t

    def split(t):
        return t.reshape(B, S, num_heads, D).transpose(0, 2, 1, 3)  # (B, H, S, D)

    q, k, v = split(q), split(k), split(v)
    scores = jnp.einsum('bhqd,bhkd->bhqk', q, k)          # no scaling (GPT-Neo)
    causal = jnp.tril(jnp.ones((S, S), dtype=bool))[None, None]
    scores = jnp.where(causal, scores, jnp.finfo(jnp.float32).min)
    probs = jax.nn.softmax(scores, axis=-1)
    o = jnp.einsum('bhqk,bhkd->bhqd', probs, v)
    o = o.transpose(0, 2, 1, 3).reshape(B, S, E)
    return o @ wo_t + bo.reshape(1, E)


if __name__ == "__main__":
    # Small config consistent with the module: hidden_size=32, num_heads=4,
    # head_dim=8, batch=2, seq=8 (<= max_position_embeddings).
    B, S, E, H = 2, 8, 32, 4

    key = jax.random.PRNGKey(0)
    kx, kq, kk, kv, ko, kb = jax.random.split(key, 6)

    x = jax.random.normal(kx, (B, S, E), dtype=jnp.float32)
    # Deterministic parameter init (std=0.02 like GPT-Neo); torch layout (out, in).
    wq = 0.02 * jax.random.normal(kq, (E, E), dtype=jnp.float32)
    wk = 0.02 * jax.random.normal(kk, (E, E), dtype=jnp.float32)
    wv = 0.02 * jax.random.normal(kv, (E, E), dtype=jnp.float32)
    wo = 0.02 * jax.random.normal(ko, (E, E), dtype=jnp.float32)
    bo = 0.02 * jax.random.normal(kb, (E,), dtype=jnp.float32)

    # Pre-transpose weights so the kernel does y = x @ W^T like nn.Linear.
    wq_t, wk_t, wv_t, wo_t = wq.T, wk.T, wv.T, wo.T

    # matmul_dtype=jnp.float32 preserves the module's numerics; pass
    # jnp.bfloat16 on v6e/v7x for the fast MXU path (loosen tolerances then).
    out = gpt_neo_self_attention(x, wq_t, wk_t, wv_t, wo_t, bo, num_heads=H,
                                 matmul_dtype=jnp.float32)
    out = jax.block_until_ready(out)

    ref = reference_gpt_neo_self_attention(
        x, wq_t, wk_t, wv_t, wo_t, bo, num_heads=H)

    assert out.shape == (B, S, E) and out.dtype == jnp.float32
    # Slightly looser than exact-divide tolerance because of the EUP
    # approximate reciprocal in the in-kernel softmax normalize.
    assert jnp.allclose(out, ref, rtol=3e-3, atol=3e-4), "mismatch vs reference"
    print("KERNEL_OK")
</pallas_src>

<mosaic_0001>
module attributes {stable_mosaic.version = 11 : i64} {
  func.func @_gpt_neo_attn_kernel(%arg0: i32, %arg1: i32, %arg2: memref<1x8x32xf32, #tpu.memory_space<vmem>>, %arg3: memref<1x32x24xf32, #tpu.memory_space<vmem>>, %arg4: memref<1x8x32xf32, #tpu.memory_space<vmem>>, %arg5: memref<1x32xf32, #tpu.memory_space<vmem>>, %arg6: memref<1x8x32xf32, #tpu.memory_space<vmem>>, %arg7: memref<8x32xf32, #tpu.memory_space<vmem>>, %arg8: memref<8x8xf32, #tpu.memory_space<vmem>>, %arg9: memref<8x8xf32, #tpu.memory_space<vmem>>, %arg10: memref<8x1xf32, #tpu.memory_space<vmem>>, %arg11: memref<8x1xf32, #tpu.memory_space<vmem>>, %arg12: memref<8x8xf32, #tpu.memory_space<vmem>>) attributes {dimension_semantics = [#tpu.dimension_semantics<parallel>, #tpu.dimension_semantics<arbitrary>], iteration_bounds = array<i64: 2, 4>, scalar_prefetch = 0 : i64, scratch_operands = 6 : i64, tpu.core_type = #tpu.core_type<tc>, window_params = [{transform_indices = @transform_0, window_bounds = array<i64: 1, 8, 32>}, {transform_indices = @transform_1, window_bounds = array<i64: 1, 32, 24>}, {transform_indices = @transform_2, window_bounds = array<i64: 1, 8, 32>}, {pipeline_mode = #tpu.pipeline_mode<synchronous>, transform_indices = @transform_3, window_bounds = array<i64: 1, 32>}, {transform_indices = @transform_4, window_bounds = array<i64: 1, 8, 32>}]} {
    %c0_i32 = arith.constant 0 : i32
    %0 = arith.cmpi eq, %arg1, %c0_i32 : i32
    %1 = arith.extui %0 : i1 to i32
    %c0_i32_0 = arith.constant 0 : i32
    %2 = arith.cmpi ne, %1, %c0_i32_0 : i32
    scf.if %2 {
      %cst_54 = arith.constant 0.000000e+00 : f32
      %71 = vector.broadcast %cst_54 : f32 to vector<8x32xf32>
      %c0_55 = arith.constant 0 : index
      %c0_56 = arith.constant 0 : index
      %72 = vector.load %arg7[%c0_55, %c0_56] : memref<8x32xf32, #tpu.memory_space<vmem>>, vector<8x32xf32>
      tpu.vector_store %arg7[%c0_55, %c0_56], %71 {strides = array<i32>} : memref<8x32xf32, #tpu.memory_space<vmem>>, vector<8x32xf32>,
    } else {
    }
    %c0 = arith.constant 0 : index
    %c0_1 = arith.constant 0 : index
    %c0_2 = arith.constant 0 : index
    %3 = vector.load %arg2[%c0, %c0_1, %c0_2] : memref<1x8x32xf32, #tpu.memory_space<vmem>>, vector<1x8x32xf32>
    %4 = vector.shape_cast %3 : vector<1x8x32xf32> to vector<8x32xf32>
    %c0_3 = arith.constant 0 : index
    %c0_4 = arith.constant 0 : index
    %c0_5 = arith.constant 0 : index
    %5 = vector.load %arg3[%c0_3, %c0_4, %c0_5] : memref<1x32x24xf32, #tpu.memory_space<vmem>>, vector<1x32x24xf32>
    %6 = vector.shape_cast %5 : vector<1x32x24xf32> to vector<32x24xf32>
    %cst = arith.constant dense<0.000000e+00> : vector<8x24xf32>
    %7 = tpu.matmul %4, %6, %cst {dimension_numbers = #tpu.dot_dimension_numbers<[1], [0], [0], [1], [0, 0, 1, 1], [], []>} : vector<8x32xf32>, vector<32x24xf32>, vector<8x24xf32> -> vector<8x24xf32>
    %8 = vector.extract_strided_slice %7 {offsets = [0, 0], sizes = [8, 8], strides = [1, 1]} : vector<8x24xf32> to vector<8x8xf32>
    %9 = vector.extract_strided_slice %7 {offsets = [0, 8], sizes = [8, 8], strides = [1, 1]} : vector<8x24xf32> to vector<8x8xf32>
    %c0_6 = arith.constant 0 : index
    %c0_7 = arith.constant 0 : index
    %10 = vector.load %arg8[%c0_6, %c0_7] : memref<8x8xf32, #tpu.memory_space<vmem>>, vector<8x8xf32>
    tpu.vector_store %arg8[%c0_6, %c0_7], %9 {strides = array<i32>} : memref<8x8xf32, #tpu.memory_space<vmem>>, vector<8x8xf32>,
    %11 = vector.extract_strided_slice %7 {offsets = [0, 16], sizes = [8, 8], strides = [1, 1]} : vector<8x24xf32> to vector<8x8xf32>
    %c0_8 = arith.constant 0 : index
    %c0_9 = arith.constant 0 : index
    %12 = vector.load %arg9[%c0_8, %c0_9] : memref<8x8xf32, #tpu.memory_space<vmem>>, vector<8x8xf32>
    tpu.vector_store %arg9[%c0_8, %c0_9], %11 {strides = array<i32>} : memref<8x8xf32, #tpu.memory_space<vmem>>, vector<8x8xf32>,
    %cst_10 = arith.constant -3.40282347E+38 : f32
    %13 = vector.broadcast %cst_10 : f32 to vector<8x1xf32>
    %c0_11 = arith.constant 0 : index
    %c0_12 = arith.constant 0 : index
    %14 = vector.load %arg10[%c0_11, %c0_12] : memref<8x1xf32, #tpu.memory_space<vmem>>, vector<8x1xf32>
    tpu.vector_store %arg10[%c0_11, %c0_12], %13 {strides = array<i32>} : memref<8x1xf32, #tpu.memory_space<vmem>>, vector<8x1xf32>,
    %cst_13 = arith.constant 0.000000e+00 : f32
    %15 = vector.broadcast %cst_13 : f32 to vector<8x1xf32>
    %c0_14 = arith.constant 0 : index
    %c0_15 = arith.constant 0 : index
    %16 = vector.load %arg11[%c0_14, %c0_15] : memref<8x1xf32, #tpu.memory_space<vmem>>, vector<8x1xf32>
    tpu.vector_store %arg11[%c0_14, %c0_15], %15 {strides = array<i32>} : memref<8x1xf32, #tpu.memory_space<vmem>>, vector<8x1xf32>,
    %cst_16 = arith.constant 0.000000e+00 : f32
    %17 = vector.broadcast %cst_16 : f32 to vector<8x8xf32>
    %c0_17 = arith.constant 0 : index
    %c0_18 = arith.constant 0 : index
    %18 = vector.load %arg12[%c0_17, %c0_18] : memref<8x8xf32, #tpu.memory_space<vmem>>, vector<8x8xf32>
    tpu.vector_store %arg12[%c0_17, %c0_18], %17 {strides = array<i32>} : memref<8x8xf32, #tpu.memory_space<vmem>>, vector<8x8xf32>,
    %19 = tpu.iota {dimensions = array<i32: 0>} : vector<8x8xi32>
    %20 = tpu.iota {dimensions = array<i32: 1>} : vector<8x8xi32>
    %c0_i32_19 = arith.constant 0 : i32
    %c1_i32 = arith.constant 1 : i32
    %21 = arith.muli %c0_i32_19, %c1_i32 : i32
    %c0_i32_20 = arith.constant 0 : i32
    %22 = arith.addi %c0_i32_20, %21 : i32
    %c8_i32 = arith.constant 8 : i32
    %23 = arith.muli %22, %c8_i32 : i32
    %24 = tpu.assume_multiple %23, 8 : i32
    %25 = arith.index_cast %24 : i32 to index
    %c0_21 = arith.constant 0 : index
    %26 = vector.load %arg8[%25, %c0_21] : memref<8x8xf32, #tpu.memory_space<vmem>>, vector<8x8xf32>
    %27 = arith.index_cast %24 : i32 to index
    %c0_22 = arith.constant 0 : index
    %28 = vector.load %arg9[%27, %c0_22] : memref<8x8xf32, #tpu.memory_space<vmem>>, vector<8x8xf32>
    %cst_23 = arith.constant dense<0.000000e+00> : vector<8x8xf32>
    %29 = tpu.matmul %8, %26, %cst_23 {dimension_numbers = #tpu.dot_dimension_numbers<[1], [1], [0], [0], [0, 0, 1, 0], [], []>} : vector<8x8xf32>, vector<8x8xf32>, vector<8x8xf32> -> vector<8x8xf32>
    %30 = vector.broadcast %24 : i32 to vector<8x8xi32>
    %31 = arith.addi %20, %30 : vector<8x8xi32>
    %32 = arith.cmpi sle, %31, %19 : vector<8x8xi32>
    %cst_24 = arith.constant -3.40282347E+38 : f32
    %33 = vector.broadcast %cst_24 : f32 to vector<8x8xf32>
    %34 = arith.select %32, %29, %33 : vector<8x8xi1>, vector<8x8xf32>
    %c0_25 = arith.constant 0 : index
    %c0_26 = arith.constant 0 : index
    %35 = vector.load %arg10[%c0_25, %c0_26] : memref<8x1xf32, #tpu.memory_space<vmem>>, vector<8x1xf32>
    %cst_27 = arith.constant dense<0xFF800000> : vector<8xf32>
    %36 = vector.multi_reduction <maximumf>, %34, %cst_27 [1] : vector<8x8xf32> to vector<8xf32>
    %37 = vector.shape_cast %36 : vector<8xf32> to vector<8x1xf32>
    %38 = arith.maximumf %35, %37 : vector<8x1xf32>
    %39 = arith.subf %35, %38 : vector<8x1xf32>
    %40 = math.exp %39 : vector<8x1xf32>
    %41 = vector.broadcast %38 : vector<8x1xf32> to vector<8x8xf32>
    %42 = arith.subf %34, %41 : vector<8x8xf32>
    %43 = math.exp %42 : vector<8x8xf32>
    %c0_28 = arith.constant 0 : index
    %c0_29 = arith.constant 0 : index
    %44 = vector.load %arg11[%c0_28, %c0_29] : memref<8x1xf32, #tpu.memory_space<vmem>>, vector<8x1xf32>
    %45 = arith.mulf %40, %44 : vector<8x1xf32>
    %cst_30 = arith.constant dense<0.000000e+00> : vector<8xf32>
    %46 = vector.multi_reduction <add>, %43, %cst_30 [1] : vector<8x8xf32> to vector<8xf32>
    %47 = vector.shape_cast %46 : vector<8xf32> to vector<8x1xf32>
    %48 = arith.addf %45, %47 : vector<8x1xf32>
    %c0_31 = arith.constant 0 : index
    %c0_32 = arith.constant 0 : index
    %49 = vector.load %arg11[%c0_31, %c0_32] : memref<8x1xf32, #tpu.memory_space<vmem>>, vector<8x1xf32>
    tpu.vector_store %arg11[%c0_31, %c0_32], %48 {strides = array<i32>} : memref<8x1xf32, #tpu.memory_space<vmem>>, vector<8x1xf32>,
    %c0_33 = arith.constant 0 : index
    %c0_34 = arith.constant 0 : index
    %50 = vector.load %arg12[%c0_33, %c0_34] : memref<8x8xf32, #tpu.memory_space<vmem>>, vector<8x8xf32>
    %51 = vector.broadcast %40 : vector<8x1xf32> to vector<8x8xf32>
    %52 = arith.mulf %51, %50 : vector<8x8xf32>
    %cst_35 = arith.constant dense<0.000000e+00> : vector<8x8xf32>
    %53 = tpu.matmul %43, %28, %cst_35 {dimension_numbers = #tpu.dot_dimension_numbers<[1], [0], [0], [1], [0, 0, 1, 1], [], []>} : vector<8x8xf32>, vector<8x8xf32>, vector<8x8xf32> -> vector<8x8xf32>
    %54 = arith.addf %52, %53 : vector<8x8xf32>
    %c0_36 = arith.constant 0 : index
    %c0_37 = arith.constant 0 : index
    %55 = vector.load %arg12[%c0_36, %c0_37] : memref<8x8xf32, #tpu.memory_space<vmem>>, vector<8x8xf32>
    tpu.vector_store %arg12[%c0_36, %c0_37], %54 {strides = array<i32>} : memref<8x8xf32, #tpu.memory_space<vmem>>, vector<8x8xf32>,
    %c0_38 = arith.constant 0 : index
    %c0_39 = arith.constant 0 : index
    %56 = vector.load %arg10[%c0_38, %c0_39] : memref<8x1xf32, #tpu.memory_space<vmem>>, vector<8x1xf32>
    tpu.vector_store %arg10[%c0_38, %c0_39], %38 {strides = array<i32>} : memref<8x1xf32, #tpu.memory_space<vmem>>, vector<8x1xf32>,
    %c1_i32_40 = arith.constant 1 : i32
    %c0_41 = arith.constant 0 : index
    %c0_42 = arith.constant 0 : index
    %57 = vector.load %arg12[%c0_41, %c0_42] : memref<8x8xf32, #tpu.memory_space<vmem>>, vector<8x8xf32>
    %c0_43 = arith.constant 0 : index
    %c0_44 = arith.constant 0 : index
    %58 = vector.load %arg11[%c0_43, %c0_44] : memref<8x1xf32, #tpu.memory_space<vmem>>, vector<8x1xf32>
    %59 = tpu.reciprocal %58 {approx = true} : vector<8x1xf32> -> vector<8x1xf32>
    %60 = vector.broadcast %59 : vector<8x1xf32> to vector<8x8xf32>
    %61 = arith.mulf %57, %60 : vector<8x8xf32>
    %c0_45 = arith.constant 0 : index
    %c0_46 = arith.constant 0 : index
    %62 = vector.load %arg7[%c0_45, %c0_46] : memref<8x32xf32, #tpu.memory_space<vmem>>, vector<8x32xf32>
    %c0_47 = arith.constant 0 : index
    %c0_48 = arith.constant 0 : index
    %c0_49 = arith.constant 0 : index
    %63 = vector.load %arg4[%c0_47, %c0_48, %c0_49] : memref<1x8x32xf32, #tpu.memory_space<vmem>>, vector<1x8x32xf32>
    %64 = vector.shape_cast %63 : vector<1x8x32xf32> to vector<8x32xf32>
    %cst_50 = arith.constant dense<0.000000e+00> : vector<8x32xf32>
    %65 = tpu.matmul %61, %64, %cst_50 {dimension_numbers = #tpu.dot_dimension_numbers<[1], [0], [0], [1], [0, 0, 1, 1], [], []>} : vector<8x8xf32>, vector<8x32xf32>, vector<8x32xf32> -> vector<8x32xf32>
    %66 = arith.addf %62, %65 : vector<8x32xf32>
    %c0_51 = arith.constant 0 : index
    %c0_52 = arith.constant 0 : index
    %67 = vector.load %arg7[%c0_51, %c0_52] : memref<8x32xf32, #tpu.memory_space<vmem>>, vector<8x32xf32>
    tpu.vector_store %arg7[%c0_51, %c0_52], %66 {strides = array<i32>} : memref<8x32xf32, #tpu.memory_space<vmem>>, vector<8x32xf32>,
    %c3_i32 = arith.constant 3 : i32
    %68 = arith.cmpi eq, %arg1, %c3_i32 : i32
    %69 = arith.extui %68 : i1 to i32
    %c0_i32_53 = arith.constant 0 : i32
    %70 = arith.cmpi ne, %69, %c0_i32_53 : i32
    scf.if %70 {
      %c0_54 = arith.constant 0 : index
      %c0_55 = arith.constant 0 : index
      %71 = vector.load %arg7[%c0_54, %c0_55] : memref<8x32xf32, #tpu.memory_space<vmem>>, vector<8x32xf32>
      %c0_56 = arith.constant 0 : index
      %c0_57 = arith.constant 0 : index
      %72 = vector.load %arg5[%c0_56, %c0_57] : memref<1x32xf32, #tpu.memory_space<vmem>>, vector<1x32xf32>
      %73 = vector.broadcast %72 : vector<1x32xf32> to vector<8x32xf32>
      %74 = arith.addf %71, %73 : vector<8x32xf32>
      %c0_58 = arith.constant 0 : index
      %c0_59 = arith.constant 0 : index
      %c0_60 = arith.constant 0 : index
      %75 = vector.load %arg6[%c0_58, %c0_59, %c0_60] : memref<1x8x32xf32, #tpu.memory_space<vmem>>, vector<1x8x32xf32>
      %76 = vector.shape_cast %75 : vector<1x8x32xf32> to vector<8x32xf32>
      %77 = vector.shape_cast %74 : vector<8x32xf32> to vector<1x8x32xf32>
      tpu.vector_store %arg6[%c0_58, %c0_59, %c0_60], %77 {strides = array<i32>} : memref<1x8x32xf32, #tpu.memory_space<vmem>>, vector<1x8x32xf32>,
    } else {
    }
    return
  }
  func.func @transform_0(%arg0: i32, %arg1: i32) -> (i32, i32, i32) {
    %c0_i32 = arith.constant 0 : i32
    %c0_i32_0 = arith.constant 0 : i32
    %c0_i32_1 = arith.constant 0 : i32
    return %arg0, %c0_i32, %c0_i32_0 : i32, i32, i32
  }
  func.func @transform_1(%arg0: i32, %arg1: i32) -> (i32, i32, i32) {
    %c0_i32 = arith.constant 0 : i32
    %c0_i32_0 = arith.constant 0 : i32
    %c0_i32_1 = arith.constant 0 : i32
    return %arg1, %c0_i32, %c0_i32_0 : i32, i32, i32
  }
  func.func @transform_2(%arg0: i32, %arg1: i32) -> (i32, i32, i32) {
    %c0_i32 = arith.constant 0 : i32
    %c0_i32_0 = arith.constant 0 : i32
    %c0_i32_1 = arith.constant 0 : i32
    return %arg1, %c0_i32, %c0_i32_0 : i32, i32, i32
  }
  func.func @transform_3(%arg0: i32, %arg1: i32) -> (i32, i32) {
    %c0_i32 = arith.constant 0 : i32
    %c0_i32_0 = arith.constant 0 : i32
    %c0_i32_1 = arith.constant 0 : i32
    return %c0_i32, %c0_i32_0 : i32, i32
  }
  func.func @transform_4(%arg0: i32, %arg1: i32) -> (i32, i32, i32) {
    %c0_i32 = arith.constant 0 : i32
    %c0_i32_0 = arith.constant 0 : i32
    %c0_i32_1 = arith.constant 0 : i32
    return %arg0, %c0_i32, %c0_i32_0 : i32, i32, i32
  }
}

</mosaic_0001>

<bundles_post_ra>
// kernel: tpu_custom_call.1
= control target key start
LH: loop header
LB: loop body
LE: loop exit
PB: predicated region body
PF: predicated region fallthrough
CT: control target
= control target key end

     0   :  { %9 = vsyncpa [#allocation9], 0  ;;  %s1197_s0 = inlined_call_operand.vmem [shape: f32[2,8,32], index: 0, kind: input, shape index: {}]   ;;  %s1198_s1 = inlined_call_operand.vmem [shape: f32[4,32,24], index: 1, kind: input, shape index: {}]   ;;  %s1199_s2 = inlined_call_operand.vmem [shape: f32[4,8,32], index: 2, kind: input, shape index: {}]   ;;  %s1200_s3 = inlined_call_operand.vmem [shape: f32[1,32], index: 3, kind: input, shape index: {}]   ;;  %s1201_s4 = inlined_call_operand.hbm [shape: f32[2,8,32], index: 4, kind: output, shape index: {}]  }
   0x1   :  { %11 = vsyncpa [#allocation9 + $0x1], 0  ;;  %s1023_s15 = smov 0   ;;  %s1025_s16 = smov 0  }
   0x2   :  { %s1027_s17 = smov 0   ;;  %s1029_s18 = smov 0  }
   0x3   :  { %s1031_s19 = smov 0   ;;  %s1033_s20 = smov 0  }
   0x4   :  { %s1035_s21 = smov 0   ;;  %s1037_s22 = smov 0  }
   0x5 LB: > { %1205 = sst [smem:[#allocation11_spill]] %s983_s21  ;;  %s740_s23 = sadd.s32 4294967295, %s987_s22   ;;  %s987_s22 = sphi %s1037_s22, %s17_s22   ;;  %s983_s21 = sphi %s1035_s21, %s1213_s21   ;;  %s979_s20 = sphi %s1033_s20, %s1218_s20   ;;  %s975_s19 = sphi %s1031_s19, %s1211_s19   ;;  %s971_s18 = sphi %s1029_s18, %s1217_s18   ;;  %s967_s17 = sphi %s1027_s17, %s1216_s17   ;;  %s963_s16 = sphi %s1025_s16, %s1215_s16   ;;  %s959_s15 = sphi %s1023_s15, %s1214_s15  }
   0x6   : > { %s741_s24 = sadd.s32 4294967294, %s987_s22   ;;  %s26_s25 = sadd.s32 1, %s979_s20 }
   0x7   : > { %p27_p0 = scmp.ge.s32.totalorder %s26_s25, 4  ;;  %s29_s26 = sadd.s32 1, %s983_s21 }
   0x8   : > { %p145_p1 = scmp.ne.s32.totalorder %s967_s17, %s963_s16  ;;  %p146_p2 = scmp.eq.s32.totalorder %s740_s23, 7 }
   0x9   : > { %s1220_s25 = smov (%p27_p0, %s26_s25), 0  ;;  %s1222_s26 = smov (!%p27_p0, %s29_s26), %s983_s21 }
   0xa   : > { %1206 = sst [smem:[#allocation12_spill]] %s1220_s25  ;;  %p1072_p3 = por %p146_p2, %p145_p1 }
   0xb   : > { %p151_p4 = scmp.ne.s32.totalorder %s963_s16, %s959_s15  ;;  %p31_p5 = scmp.ge.s32.totalorder %s1222_s26, 2 }
   0xc   : > { %p152_p6 = scmp.eq.s32.totalorder %s741_s24, 7  ;;  %p744_p7 = scmp.ge.s32.totalorder %s987_s22, 1 }
   0xd   : > { %p195_p8 = scmp.lt.s32.totalorder %s987_s22, 9  ;;  %s1224_s26 = smov (%p31_p5, %s1222_s26), 0 }
   0xe   : > { %1208 = sst [smem:[#allocation13_spill]] %s1224_s26  ;;  %p1082_p9 = por %p152_p6, %p151_p4 }
   0xf   : > { %p196_p10 = pnand %p744_p7, %p195_p8  ;;  %s132_s29 = ssub.s32 %s983_s21, %s1224_s26 }
  0x10   : > { %s135_s30 = sadd.s32 1, %s967_s17  ;;  %p133_p11 = scmp.eq.s32.totalorder %s132_s29, 0 }
  0x11   : > { %199 = sbr.rel (%p196_p10) target bundleno = 1426 (0x592), region = 36  ;;  %s1203_s6 = sand.u32 (!%p196_p10), 1, %s963_s16  }
  0x12   : > { %s1090_s5 = scalar_select %p133_p11, %s967_s17, %s135_s30  }
  0x13   : > { %p229_p12 = scmp.lt.s32.totalorder (!%p196_p10), %s975_s19, 1  ;;  %s1096_s7 = sshll.u32 (!%p196_p10), %s1203_s6, 3 }
  0x14   : > { %p233_p13 = scmp.lt.s32.totalorder (!%p196_p10), %s971_s18, 3  ;;  %s228_s21 = scalar_lea.vmem (!%p196_p10), [#allocation8], %s1096_s7 }
  0x15   : > { %p750_p0 = scmp.ne.s32.totalorder (!%p196_p10), %s971_s18, 0 }
  0x18   : > { %s230_s8 = scalar_select %p229_p12, %s975_s19, 1 }
  0x19   : > { %s234_s9 = scalar_select %p233_p13, %s971_s18, 3 }
  0x1a   : > { %s746_s10 = sshll.u32 %s230_s8, 3  ;;  %245 = sbr.rel (%p750_p0) target bundleno = 33 (0x21), region = 40  ;;  %vm246_vm0 = vcmask (!%p750_p0), 261120   ;;  %v989_v0 = vmov (!%p750_p0), 0.0  }
  0x1b   : > { %s232_s13 = scalar_lea.vmem %s1197_s0, %s746_s10  ;;  %s762_s14 = sshll.u32 %s234_s9, 5  ;;  %247 = vst.msk [vmem:[#allocation2] sm:$0xff] (!%p750_p0), %vm246_vm0, %v989_v0 }
  0x1c   : > { %s237_s29 = scalar_lea.vmem %s1198_s1, %s762_s14  ;;  %s749_s30 = sshll.u32 %s234_s9, 3 }
  0x1d   : > { %s1110_s6 = scalar_lea.vmem %s1199_s2, %s749_s30 }
  0x21 PF: > { %v249_v1 = vld [vmem:[%s237_s29] sm:$0xff]  ;;  %v250_v2 = vld [vmem:[%s237_s29 + $0x8] sm:$0xff]  ;;  %v251_v3 = vld [vmem:[%s237_s29 + $0x10] sm:$0xff]  ;;  %v990_v4 = vmov 0.0|0.0   ;;  %vm991_vm1 = vmmov 0   ;;  %v992_v7 = vmov 0.0   ;;  %v341_v15 = vlaneseq }
  0x22   : > { %800 = vmatprep.subr.bf16.mxu0 %v990_v4  ;;  %v801_v5 = vpack.c.bf16 %v250_v2, %v249_v1  ;;  %v252_v6 = vld [vmem:[%s237_s29 + $0x18] sm:$0xff]  ;;  %782 = vmatprep.mubr.msk.f32.mxu0 %vm991_vm1, %v992_v7  ;;  %v248_v9 = vld [vmem:[%s232_s13] sm:$0xff]  ;;  %vm253_vm2 = vcmask 261120   ;;  %vm331_vm3 = vcmask 64512   ;;  %s993_s25 = smov 120   ;;  %vm337_vm4 = vcmask 7168  }
  0x23   : > { %785 = vmatprep.subr.mxu1 %v992_v7  ;;  %787 = vmatprep.mubr.msk.f32.mxu1 %vm991_vm1, %v992_v7  ;;  %v804_v8 = vpack.c.bf16 %v252_v6, %v251_v3  ;;  %340 = vst.msk [vmem:[#allocation7] sm:$0xff] %vm331_vm3, %v992_v7  ;;  %v994_v14 = vmov -3.4028235e+38   ;;  %v342_v16 = vshrl.u32 %v341_v15, 7  ;;  %v344_v17 = vand.u32 127, %v341_v15  ;;  %s996_s26 = smov 112  }
  0x24   : > { %802 = vmatpush3.bf16.msra.mxu0 %v801_v5  ;;  %338 = vst.msk [vmem:[#allocation5] sm:$0xff] %vm337_vm4, %v994_v14  ;;  %339 = vst.msk [vmem:[#allocation6] sm:$0xff] %vm337_vm4, %v992_v7  ;;  %v995_v22 = vmov 0   ;;  %v542_v36 = vld [vmem:[%s1110_s6] sm:$0xff]  ;;  %p756_p1 = scmp.ne.s32.totalorder %s971_s18, 3 }
  0x25   : > { %803 = vmatprep.subr.bf16.mxu0 %v990_v4  ;;  %vm424_vm5 = vcmp.le.s32.totalorder %v344_v17, %v342_v16  ;;  %885 = vset.pattern.permute.xlu1 %v995_v22  ;;  %v541_v52 = vld [vmem:[#allocation2] sm:$0xff] }
  0x26   : > { %886 = vset.pattern.permute.xlu0 %v995_v22  ;;  %v757_v57 = vld [vmem:[%s1200_s3] ss:$0 sm:$0xff] (!%p756_p1) }
  0x28   : > { %805 = vmatpush3.bf16.msra.mxu0 %v804_v8 }
  0x29   : > { %795 = vmatprep.subr.mxu0 %v992_v7 }
  0x2a   : > { %v449_v43 = vld [vmem:[#allocation7] sm:$0xff] }
  0x2b   : > { %783 = vmatmul.mubr.msk.f32.vlgmr.msra.gmra.mrb[0].mxu0 %vm253_vm2, %v248_v9  ;;  %v426_v23 = vld [vmem:[#allocation5] sm:$0xff]  ;;  %v442_v37 = vld [vmem:[#allocation6] sm:$0xff] }
  0x2c   : > { %797 = vmatprep.mubr.msk.f32.mxu0 %vm991_vm1, %v992_v7  ;;  %796 = vmatpush3.msra.mxu0 %v542_v36 }
  0xfe   : > { %v323_v10 = vpop.f32.mrb[0].mxu0 }
  0xff   : > { %328 = vrot.lane.b32.xlu0 %v323_v10, %s993_s25  ;;  %v784_v11 = vpop.f32.mrb[1].mxu0 }
 0x171   : > { %v329_v12 = vpop.permute.xlu0 %328 }
 0x172   : > { %332 = vst.msk [vmem:[#allocation3] sm:$0xff] %vm331_vm3, %v329_v12 }
 0x179   : > { %v345_v13 = vld [vmem:[#allocation3] sm:$0xff] }
 0x17a   : > { %786 = vmatpush3.xpose.msk.msra.mxu1 %vm331_vm3, %v345_v13 }
 0x17b   : > { %790 = vmatprep.subr.mxu1 %v992_v7 }
 0x17d   : > { %788 = vmatmul.mubr.msk.f32.vlgmr.msra.gmra.mrb[0].mxu1 %vm331_vm3, %v323_v10 }
 0x17e   : > { %792 = vmatprep.mubr.msk.f32.mxu1 %vm991_vm1, %v992_v7 }
 0x250   : > { %v418_v18 = vpop.f32.mrb[0].mxu1 }
 0x251   : > { %v425_v19 = vsel %vm424_vm5, %v418_v18, -3.4028235e+38  ;;  %v789_v20 = vpop.f32.mrb[1].mxu1 }
 0x252   : > { %v427_v21 = vsel %vm331_vm3, %v425_v19, -inf }
 0x253   : > { %428 = vmax.xlane.f32.xlu0 %v427_v21 }
 0x2e0   : > { %v429_v24 = vpop.xlane.xlu0 %428 }
 0x2e1   : > { %v430_v25 = vmax.f32 %v426_v23, %v429_v24 }
 0x2e3   : > { %v431_v26 = vsub.f32 %v426_v23, %v430_v25  ;;  %531 = vst.msk [vmem:[#allocation5] sm:$0xff] %vm337_vm4, %v430_v25  ;;  %436 = vperm.xlu1 %885, %v430_v25  }
 0x2e5   : > { %v432_v27 = vmul.f32 1.442695, %v431_v26 }
 0x2e7   : > { %887 = vpow2.f32 %v432_v27  ;;  %333 = vrot.lane.b32.xlu1 %v323_v10, %s996_s26 }
 0x2f1   : > { %v888_v28 = vpop.eup %887 }
 0x2f2   : > { %452 = vperm.xlu0 %886, %v888_v28   ;;  %v443_v38 = vmul.f32 %v888_v28, %v442_v37 }
 0x362   : > { %v437_v29 = vpop.permute.xlu1 %436 }
 0x363   : > { %v439_v30 = vsub.f32 %v425_v19, %v437_v29 }
 0x365   : > { %v440_v31 = vmul.f32 1.442695, %v439_v30 }
 0x366   : > { %v334_v32 = vpop.permute.xlu1 %333 }
 0x367   : > { %889 = vpow2.f32 %v440_v31  ;;  %336 = vst.msk [vmem:[#allocation4] sm:$0xff] %vm331_vm3, %v334_v32 }
 0x36e   : > { %v346_v33 = vld [vmem:[#allocation4] sm:$0xff] }
 0x36f   : > { %791 = vmatpush3.msra.mxu1 %v346_v33 }
 0x371   : > { %v890_v34 = vpop.eup %889  ;;  %v453_v44 = vpop.permute.xlu0 %452 }
 0x372   : > { %793 = vmatmul.mubr.msk.f32.vlgmr.msra.gmra.mrb[2].mxu1 %vm331_vm3, %v890_v34  ;;  %v444_v35 = vsel %vm331_vm3, %v890_v34, 0.0  ;;  %v455_v45 = vmul.f32 %v453_v44, %v449_v43 }
 0x373   : > { %445 = vadd.xlane.f32.xlu1 %v444_v35 }
 0x400   : > { %v446_v39 = vpop.xlane.xlu1 %445 }
 0x401   : > { %v447_v40 = vadd.f32 %v446_v39, %v443_v38 }
 0x403   : > { %448 = vst.msk [vmem:[#allocation6] sm:$0xff] %vm337_vm4, %v447_v40 }
 0x40a   : > { %v533_v41 = vld [vmem:[#allocation6] sm:$0xff] }
 0x40b   : > { %891 = vrcp.f32 %v533_v41 }
 0x415   : > { %v892_v42 = vpop.eup %891 }
 0x416   : > { %537 = vperm.xlu1 %885, %v892_v42  }
 0x445   : > { %v525_v46 = vpop.f32.mrb[2].mxu1 }
 0x446   : > { %v529_v47 = vadd.f32 %v525_v46, %v455_v45  ;;  %v794_v48 = vpop.f32.mrb[3].mxu1 }
 0x448   : > { %530 = vst.msk [vmem:[#allocation7] sm:$0xff] %vm331_vm3, %v529_v47 }
 0x44f   : > { %v532_v50 = vld [vmem:[#allocation7] sm:$0xff] }
 0x495   : > { %v538_v49 = vpop.permute.xlu1 %537 }
 0x496   : > { %v540_v51 = vmul.f32 %v538_v49, %v532_v50 }
 0x498   : > { %798 = vmatmul.mubr.msk.f32.vlgmr.msra.gmra.mrb[2].mxu0 %vm331_vm3, %v540_v51 }
 0x568   : > { %621 = sbr.rel (%p756_p1) target bundleno = 1401 (0x579), region = 44 }
 0x56b   : > { %v612_v53 = vpop.f32.mrb[2].mxu0 }
 0x56c   : > { %v616_v54 = vadd.f32 %v612_v53, %v541_v52  ;;  %v799_v55 = vpop.f32.mrb[3].mxu0 }
 0x56e   : > { %617 = vst.msk [vmem:[#allocation2] sm:$0xff] %vm253_vm2, %v616_v54 }
 0x575   : > { %v622_v56 = vld [vmem:[#allocation2] sm:$0xff] }
 0x576   : > { %v630_v58 = vadd.f32 %v757_v57, %v622_v56 }
 0x578   : > { %631 = vst.msk [vmem:[%s228_s21] sm:$0xff] %vm253_vm2, %v630_v58 }
 0x579 PF: > { %s759_s9 = sshll.u32 %s975_s19, 7  ;;  %s646_s12 = sshll.u32 %s228_s21, 4  ;;  %s647_s12 = int_to_ptr.vmem [resolvable:$true] %s646_s12 }
 0x57a   : > { %s1146_s18 = scalar_lea.hbm %s1201_s4, %s759_s9  ;;  %s1210_s13 = sand.u32 1, %s963_s16  }
 0x57b   : > { %s633_s14 = scalar_lea.sflag [#allocation9], %s1210_s13  ;;  %s893_s23 = scalar_lea.vmem %s647_s12, 128 }
 0x57c   : > { %p894_p2 = scmp.ne.s32.totalorder %s647_s12, %s893_s23  ;;  %s997_s24 = smov [#allocation8]  }
 0x57d   : > { %s897_s29 = sshll.u32 %s997_s24, 4  ;;  %s898_s29 = int_to_ptr.vmem [resolvable:$false] %s897_s29 }
 0x57e   : > { %p895_p4 = pnand %p894_p2, %p1072_p3  ;;  %s899_s30 = scalar_lea.vmem %s898_s29, 256 }
 0x57f   : > { %p900_p6 = scmp.lt.s32.totalorder %s647_s12, %s898_s29  ;;  %p901_p7 = scmp.lt.s32.totalorder %s899_s30, %s893_s23 }
 0x580   : > { %p896_p5 = pneg %p895_p4 }
 0x581   : > { %p902_p8 = por %p901_p7, %p900_p6 }
 0x583   : > { %p903_p10 = pnand %p902_p8, %p896_p5 }
 0x585   : > { %906 = shalt.err (!%p903_p10)
}
 0x586   : > { %s907_s19 = scalar_lea.hbm %s1146_s18, 128  ;;  %s911_s25 = scalar_lea.hbm %s1201_s4, 256 }
 0x587   : > { %p908_p11 = scmp.ne.s32.totalorder %s1146_s18, %s907_s19  ;;  %p912_p0 = scmp.lt.u32.totalorder %s1146_s18, %s1201_s4 }
 0x588   : > { %p913_p1 = scmp.lt.u32.totalorder %s911_s25, %s907_s19  ;;  %p915_p4 = scmp.lt.u32.totalorder %s907_s19, %s1146_s18 }
 0x589   : > { %p909_p12 = pnand %p908_p11, %p1072_p3 }
 0x58a   : > { %p914_p2 = por %p913_p1, %p912_p0 }
 0x58b   : > { %p910_p13 = pneg %p909_p12 }
 0x58c   : > { %p916_p5 = por %p915_p4, %p914_p2 }
 0x58e   : > { %p917_p6 = pnand %p916_p5, %p910_p13 }
 0x590   : > { %920 = shalt.err (!%p917_p6)
}
 0x591   : > { %806 = dma.vmem_to_hbm [thread:$0]  (%p1072_p3), %s647_s12, 128, %s1146_s18, %s633_s14  }
 0x592 PF: > { %p812_p7 = scmp.ge.s32.totalorder %s987_s22, 2  ;;  %s658_s8 = sand.u32 1, %s959_s15  }
 0x593   : > { %s659_s9 = scalar_lea.sflag [#allocation9], %s658_s8 }
 0x594   : > { %p809_p8 = pnand %p812_p7, %p1082_p9 }
 0x596   : > { %954 = dma.done.wait (!%p809_p8), %s659_s9, 128  }
 0x597   : > { %956 = vsyncadd (!%p809_p8), %s659_s9, 4294967168  ;;  %s17_s22 = sadd.s32 1, %s987_s22   ;;  %s1211_s19 = sld [smem:[#allocation11_spill]] }
 0x598   : > { %p14_p10 = scmp.ge.s32.totalorder %s17_s22, 10   ;;  %s1212_s27 = sld [smem:[#allocation12_spill]] }
 0x599   : > { %s1213_s21 = sld [smem:[#allocation13_spill]]  ;;  %s1214_s15 = smov %s963_s16 }
 0x59a   : > { %s1215_s16 = smov %s967_s17  ;;  %s1216_s17 = smov %s1090_s5 }
 0x59b   : > { %s1217_s18 = smov %s979_s20  ;;  %16 = sbr.rel (!%p14_p10) target bundleno = 5 (0x5), region = 85 }
 0x59e   : > { %s1218_s20 = smov %s1212_s27 }
 0x5a2   :  { %664 = vsyncpa [#allocation9], 1 }
 0x5a3   :  { %666 = vsyncpa [#allocation9 + $0x1], 1 }

</bundles_post_ra>
